<compile_context>
chip_gen: v7x
topology: tpu7x:2x2x1
jax: 0.10.0
libtpu: 0.0.40
codegen_flags: <defaults>
</compile_context>

<pallas_src>
import functools
import math

import jax
import jax.numpy as jnp
from jax.experimental import pallas as pl
from jax.experimental.pallas import tpu as pltpu


_SUBLANE_ALIGN = 32                 # covers f32/bf16/int8/fp8 sublane packing
_TARGET_ACTUAL_BYTES = 2 << 20      # ~2 MiB of actual input DMA per grid step
_MAX_F32EQ_BYTES = 4 << 20          # cap f32-equivalent tile footprint (VMEM temps)
_VMEM_LIMIT_BYTES = 48 << 20        # > 16/32 MiB scoped defaults, < 64 MiB v7x physical


def _round_up(x, m):
    return ((x + m - 1) // m) * m


def _default_min_steps():
    """Keep >= 8 grid steps only on v7x (2 TensorCores per chip) so the
    ('parallel',) axis can be sharded across both; single-TC chips get no floor."""
    try:
        kind = jax.devices()[0].device_kind.lower()
    except Exception:
        return 1
    if "v7" in kind or "7x" in kind:
        return 8
    return 1


def _pick_row_tile(n_rows, width, itemsize, min_steps):
    """Row tile sized from actual DMA bytes per step (dtype-aware), capped by a
    f32-equivalent footprint bound and (on v7x only) by a minimum step count."""
    rt_bw = _TARGET_ACTUAL_BYTES // (width * max(1, itemsize))
    rt_vmem = _MAX_F32EQ_BYTES // (width * 4)
    rt = max(_SUBLANE_ALIGN,
             (min(rt_bw, rt_vmem) // _SUBLANE_ALIGN) * _SUBLANE_ALIGN)
    if min_steps > 1:
        cap = _round_up(pl.cdiv(n_rows, min_steps), _SUBLANE_ALIGN)
        rt = min(rt, max(_SUBLANE_ALIGN, cap))
    if rt > n_rows:
        # Never taller than the array: either the exact row extent (< 8 rows is
        # legal only when the block equals the full dim) or a multiple of 8.
        rt = n_rows if n_rows < 8 else (n_rows // 8) * 8
    return rt


def _rmsnorm_kernel(*refs, unit_scale):
    # refs: (x, [scale], o); x tile is (rt, D) with the reduce over full lanes.
    if unit_scale:
        x_ref, o_ref = refs
        scale_ref = None
    else:
        x_ref, scale_ref, o_ref = refs
    x = x_ref[...].astype(jnp.float32)
    ms = jnp.mean(x * x, axis=-1, keepdims=True)
    rrms = jax.lax.rsqrt(ms + 1e-6)
    # Match PyTorch exactly: quantize to x dtype *before* any scale multiply.
    y = (x * rrms).astype(x_ref.dtype)
    if scale_ref is not None:
        y = y.astype(jnp.float32) * scale_ref[...]
    o_ref[...] = y.astype(o_ref.dtype)


def _rmsnorm_packed_kernel(*refs, unit_scale, inv_d, precision):
    # refs: (x, seg, [scale], o); x tile is (rt, G*D) — G logical rows packed
    # per lane-dense 128-wide row. seg is block-diagonal ones: (x*x) @ seg gives
    # every lane the sum of squares of its own D-wide segment (segmented
    # reduce + broadcast in one MXU pass; the MXU is otherwise idle here).
    if unit_scale:
        x_ref, seg_ref, o_ref = refs
        scale_ref = None
    else:
        x_ref, seg_ref, scale_ref, o_ref = refs
    x = x_ref[...].astype(jnp.float32)
    ss = jnp.dot(x * x, seg_ref[...],
                 preferred_element_type=jnp.float32,
                 precision=precision)
    rrms = jax.lax.rsqrt(ss * inv_d + 1e-6)
    y = (x * rrms).astype(x_ref.dtype)
    if scale_ref is not None:
        y = y.astype(jnp.float32) * scale_ref[...]
    o_ref[...] = y.astype(o_ref.dtype)


def rmsnorm_pallas(x, scale, out_dtype, *, row_tile=None, unit_scale=False):
    """RMSNorm over the last dim of x; output cast to out_dtype (the `.to(v)`)."""
    orig_shape = x.shape
    D = orig_shape[-1]
    R = math.prod(orig_shape[:-1])
    x2d = x.reshape(R, D)

    # Lane-dense packing: if D < 128 and divides 128, pack G = 128//D logical
    # rows into one 128-wide physical row (full-lane loads, unmasked stores).
    G = 128 // D if (D < 128 and 128 % D == 0) else 1

    pad_rows = 0
    if G > 1 and R % G != 0:
        # Only up to G-1 rows, only in the rare misaligned case.
        # TODO(synk): even this tiny pad is a full XLA copy; guarantee R % G == 0
        # at the caller to drop it entirely.
        pad_rows = G - R % G
        x2d = jnp.pad(x2d, ((0, pad_rows), (0, 0)))
    RP = (R + pad_rows) // G
    W = G * D

    # TODO(synk): verify in HLO that this minor-dim reshape (D -> 128) does not
    # trigger an XLA relayout copy; if it does, present a 128-wide view upstream.
    xw = x2d.reshape(RP, W) if G > 1 else x2d

    min_steps = _default_min_steps()
    rt = row_tile if row_tile is not None else _pick_row_tile(
        RP, W, jnp.dtype(x.dtype).itemsize, min_steps)
    grid = (pl.cdiv(RP, rt),)   # partial last block is masked by Pallas; rows
                                # are independent, so garbage tail rows are safe.

    x_spec = pl.BlockSpec((rt, W), lambda i: (i, 0))
    o_spec = pl.BlockSpec((rt, W), lambda i: (i, 0))
    # TODO(synk): if an xprof trace shows exposed DMA on v7x, sweep
    # pipeline_mode=pl.Buffered(3) on x_spec.

    in_specs = [x_spec]
    operands = [xw]

    if G > 1:
        seg = jnp.kron(jnp.eye(G, dtype=jnp.float32),
                       jnp.ones((D, D), dtype=jnp.float32))
        in_specs.append(pl.BlockSpec((W, W), lambda i: (0, 0)))  # resident
        operands.append(seg)
        precision = (jax.lax.Precision.HIGHEST if x.dtype == jnp.float32
                     else jax.lax.Precision.DEFAULT)
        kernel = functools.partial(_rmsnorm_packed_kernel, unit_scale=unit_scale,
                                   inv_d=1.0 / D, precision=precision)
    else:
        kernel = functools.partial(_rmsnorm_kernel, unit_scale=unit_scale)

    if not unit_scale:
        scale32 = scale.astype(jnp.float32).reshape(-1)
        scale_w = (jnp.tile(scale32, (G,)) if G > 1 else scale32).reshape(1, W)
        in_specs.append(pl.BlockSpec((1, W), lambda i: (0, 0)))  # resident
        operands.append(scale_w)

    out = pl.pallas_call(
        kernel,
        out_shape=jax.ShapeDtypeStruct((RP, W), out_dtype),
        grid_spec=pltpu.PrefetchScalarGridSpec(
            num_scalar_prefetch=0,
            grid=grid,
            in_specs=in_specs,
            out_specs=o_spec,
        ),
        compiler_params=pltpu.CompilerParams(
            # TODO(synk): confirm on v7x that both TensorCores are used; if one
            # idles, switch this axis to pltpu.CORE_PARALLEL semantics.
            dimension_semantics=("parallel",),
            vmem_limit_bytes=_VMEM_LIMIT_BYTES,
        ),
    )(*operands)

    if G > 1:
        out2d = out.reshape(RP * G, D)
        if pad_rows:
            out2d = out2d[:R]
        return out2d.reshape(orig_shape)
    return out.reshape(orig_shape)


def _is_all_ones(a):
    try:
        return bool(jnp.all(a == 1.0))
    except Exception:   # abstract value / tracer -> take the general path
        return False


class QKNormPallas:
    """Mirrors QKNorm: two RMSNorms (query_norm / key_norm), scale = ones(dim)."""

    def __init__(self, dim: int):
        # Same init as nn.Parameter(torch.ones(dim)).
        self.query_scale = jnp.ones((dim,), dtype=jnp.float32)
        self.key_scale = jnp.ones((dim,), dtype=jnp.float32)
        # Unit-scale fast path (guarded: non-unit / loaded scales take full path).
        self._query_unit = _is_all_ones(self.query_scale)
        self._key_unit = _is_all_ones(self.key_scale)

    def __call__(self, q, k, v):
        # Exactly follow the (unusual) forward of the given module:
        # if k is not None: return key_norm(k).to(v)  else: query_norm(q).to(v)
        if k is not None:
            return rmsnorm_pallas(k, self.key_scale, out_dtype=v.dtype,
                                  unit_scale=self._key_unit)
        else:
            return rmsnorm_pallas(q, self.query_scale, out_dtype=v.dtype,
                                  unit_scale=self._query_unit)


def _reference_rmsnorm(x, scale, out_dtype):
    x_dtype = x.dtype
    x32 = x.astype(jnp.float32)
    rrms = jax.lax.rsqrt(jnp.mean(x32 * x32, axis=-1, keepdims=True) + 1e-6)
    y = (x32 * rrms).astype(x_dtype).astype(jnp.float32) * scale.astype(jnp.float32)
    return y.astype(out_dtype)


if __name__ == "__main__":
    key = jax.random.PRNGKey(0)

    # A) Small flux-like shapes; D=32 exercises the lane-dense packed (MXU
    #    segmented-reduce) path with the unit-scale fast path.
    B, H, L, D = 2, 4, 8, 32
    kq, kk, kv = jax.random.split(key, 3)
    q = jax.random.normal(kq, (B, H, L, D), dtype=jnp.float32)
    k = jax.random.normal(kk, (B, H, L, D), dtype=jnp.float32)
    v = jax.random.normal(kv, (B, H, L, D), dtype=jnp.float32)

    qknorm = QKNormPallas(D)
    out = jax.block_until_ready(qknorm(q, k, v))        # key_norm branch
    out_q = jax.block_until_ready(qknorm(q, None, v))   # query_norm branch

    ref = _reference_rmsnorm(k, qknorm.key_scale, v.dtype)
    ref_q = _reference_rmsnorm(q, qknorm.query_scale, v.dtype)
    assert out.shape == k.shape and out.dtype == v.dtype
    assert jnp.allclose(out, ref, atol=1e-5, rtol=1e-4)
    assert jnp.allclose(out_q, ref_q, atol=1e-5, rtol=1e-4)

    # B) D=128 (flux head dim), bf16 in/out — lane-wide G=1 path.
    D2 = 128
    k2 = jax.random.normal(kk, (2, 2, 8, D2), dtype=jnp.float32).astype(jnp.bfloat16)
    v2 = jnp.zeros((2, 2, 8, D2), dtype=jnp.bfloat16)
    qknorm2 = QKNormPallas(D2)
    out2 = jax.block_until_ready(qknorm2(k2, k2, v2))
    ref2 = _reference_rmsnorm(k2, qknorm2.key_scale, v2.dtype)
    assert out2.shape == k2.shape and out2.dtype == jnp.bfloat16
    assert jnp.allclose(out2.astype(jnp.float32), ref2.astype(jnp.float32),
                        atol=2e-2, rtol=2e-2)

    # C) Non-tile-aligned row count + non-unit scale: forces a masked partial
    #    last block (no padding, no output slice) and the full scale path.
    x3 = jax.random.normal(kq, (6, 8, 128), dtype=jnp.float32)
    s3 = jnp.linspace(0.5, 1.5, 128, dtype=jnp.float32)
    out3 = jax.block_until_ready(
        rmsnorm_pallas(x3, s3, out_dtype=jnp.float32, row_tile=32))
    ref3 = _reference_rmsnorm(x3, s3, jnp.float32)
    assert jnp.allclose(out3, ref3, atol=1e-5, rtol=1e-4)

    # D) Packed path with R % G != 0 (tiny <=G-1 row pad) and non-unit scale.
    x4 = jax.random.normal(kv, (14, 32), dtype=jnp.float32)
    s4 = jnp.linspace(0.5, 2.0, 32, dtype=jnp.float32)
    out4 = jax.block_until_ready(rmsnorm_pallas(x4, s4, out_dtype=jnp.float32))
    ref4 = _reference_rmsnorm(x4, s4, jnp.float32)
    assert out4.shape == x4.shape
    assert jnp.allclose(out4, ref4, atol=1e-5, rtol=1e-4)

    print("KERNEL_OK")
</pallas_src>

<mosaic_0001>
module attributes {stable_mosaic.version = 11 : i64} {
  func.func @_rmsnorm_packed_kernel(%arg0: i32, %arg1: memref<16x128xf32, #tpu.memory_space<vmem>>, %arg2: memref<128x128xf32, #tpu.memory_space<vmem>>, %arg3: memref<16x128xf32, #tpu.memory_space<vmem>>) attributes {dimension_semantics = [#tpu.dimension_semantics<parallel>], iteration_bounds = array<i64: 1>, scalar_prefetch = 0 : i64, scratch_operands = 0 : i64, tpu.core_type = #tpu.core_type<tc>, window_params = [{transform_indices = @transform_0, window_bounds = array<i64: 16, 128>}, {pipeline_mode = #tpu.pipeline_mode<synchronous>, transform_indices = @transform_1, window_bounds = array<i64: 128, 128>}, {transform_indices = @transform_2, window_bounds = array<i64: 16, 128>}]} {
    %c0 = arith.constant 0 : index
    %c0_0 = arith.constant 0 : index
    %0 = vector.load %arg1[%c0, %c0_0] : memref<16x128xf32, #tpu.memory_space<vmem>>, vector<16x128xf32>
    %1 = arith.mulf %0, %0 : vector<16x128xf32>
    %c0_1 = arith.constant 0 : index
    %c0_2 = arith.constant 0 : index
    %2 = vector.load %arg2[%c0_1, %c0_2] : memref<128x128xf32, #tpu.memory_space<vmem>>, vector<128x128xf32>
    %cst = arith.constant dense<0.000000e+00> : vector<16x128xf32>
    %3 = tpu.matmul %1, %2, %cst {dimension_numbers = #tpu.dot_dimension_numbers<[1], [0], [0], [1], [0, 0, 1, 1], [], []>, precision = #tpu.contract_precision<fp32>} : vector<16x128xf32>, vector<128x128xf32>, vector<16x128xf32> -> vector<16x128xf32>
    %cst_3 = arith.constant 3.125000e-02 : f32
    %4 = vector.broadcast %cst_3 : f32 to vector<16x128xf32>
    %5 = arith.mulf %3, %4 : vector<16x128xf32>
    %cst_4 = arith.constant 9.99999997E-7 : f32
    %6 = vector.broadcast %cst_4 : f32 to vector<16x128xf32>
    %7 = arith.addf %5, %6 : vector<16x128xf32>
    %8 = math.rsqrt %7 : vector<16x128xf32>
    %9 = arith.mulf %0, %8 : vector<16x128xf32>
    %c0_5 = arith.constant 0 : index
    %c0_6 = arith.constant 0 : index
    %10 = vector.load %arg3[%c0_5, %c0_6] : memref<16x128xf32, #tpu.memory_space<vmem>>, vector<16x128xf32>
    tpu.vector_store %arg3[%c0_5, %c0_6], %9 {strides = array<i32>} : memref<16x128xf32, #tpu.memory_space<vmem>>, vector<16x128xf32>,
    return
  }
  func.func @transform_0(%arg0: i32) -> (i32, i32) {
    %c0_i32 = arith.constant 0 : i32
    %c0_i32_0 = arith.constant 0 : i32
    return %arg0, %c0_i32 : i32, i32
  }
  func.func @transform_1(%arg0: i32) -> (i32, i32) {
    %c0_i32 = arith.constant 0 : i32
    %c0_i32_0 = arith.constant 0 : i32
    %c0_i32_1 = arith.constant 0 : i32
    return %c0_i32, %c0_i32_0 : i32, i32
  }
  func.func @transform_2(%arg0: i32) -> (i32, i32) {
    %c0_i32 = arith.constant 0 : i32
    %c0_i32_0 = arith.constant 0 : i32
    return %arg0, %c0_i32 : i32, i32
  }
}

</mosaic_0001>

<bundles_post_ra>
// kernel: tpu_custom_call.1
= control target key start
LH: loop header
LB: loop body
LE: loop exit
PB: predicated region body
PF: predicated region fallthrough
CT: control target
= control target key end

     0   :  { %7 = vsyncpa [#allocation3], 0  ;;  %s1710_s0 = inlined_call_operand.hbm [shape: f32[16,128], index: 0, kind: input, shape index: {}]   ;;  %s1711_s1 = inlined_call_operand.hbm [shape: f32[128,128], index: 1, kind: input, shape index: {}]   ;;  %s1712_s2 = inlined_call_operand.hbm [shape: f32[16,128], index: 2, kind: output, shape index: {}]  }
   0x1   :  { %8 = vsyncpa [#allocation6], 0 }
   0x2   :  { %9 = vsyncpa [#allocation4], 0  ;;  %s1373_s9 = smov [#allocation2]   ;;  %s1301_s13 = scalar_lea.hbm %s1710_s0, 256 }
   0x3   :  { %s15_s10 = sshll.u32 %s1373_s9, 4  ;;  %p1302_p0 = scmp.ne.s32.totalorder %s1710_s0, %s1301_s13  ;;  %s16_s10 = int_to_ptr.vmem [resolvable:$true] %s15_s10 }
   0x4   :  { %p1305_p1 = scmp.lt.u32.totalorder %s1301_s13, %s1710_s0 }
   0x6   :  { %p1307_p2 = pnand %p1305_p1, %p1302_p0 }
   0x8   :  { %1310 = shalt.err (!%p1307_p2)
}
   0x9   :  { %s1311_s18 = scalar_lea.vmem %s16_s10, 256  ;;  %p1316_p4 = scmp.lt.s32.totalorder %s16_s10, %s16_s10 }
   0xa   :  { %p1312_p3 = scmp.ne.s32.totalorder %s16_s10, %s1311_s18  ;;  %p1317_p5 = scmp.lt.s32.totalorder %s1311_s18, %s1311_s18 }
   0xc   :  { %p1318_p6 = por %p1317_p5, %p1316_p4 }
   0xe   :  { %p1319_p7 = pnand %p1318_p6, %p1312_p3 }
  0x10   :  { %1322 = shalt.err (!%p1319_p7)
}
  0x11   :  { %s1374_s19 = smov 128   ;;  %s1375_s20 = smov 8  }
  0x12   :  { %21 = dma.hbm_to_vmem [thread:$0]  %s1710_s0, 256, %s16_s10, [#allocation3], %s1374_s19, %s1374_s19, %s1375_s20  }
  0x13   :  { %s1376_s23 = smov [#allocation5]   ;;  %s1323_s27 = scalar_lea.hbm %s1711_s1, 2048 }
  0x14   :  { %s27_s24 = sshll.u32 %s1376_s23, 4  ;;  %p1324_p8 = scmp.ne.s32.totalorder %s1711_s1, %s1323_s27  ;;  %s28_s24 = int_to_ptr.vmem [resolvable:$true] %s27_s24 }
  0x15   :  { %p1327_p9 = scmp.lt.u32.totalorder %s1323_s27, %s1711_s1 }
  0x17   :  { %p1329_p10 = pnand %p1327_p9, %p1324_p8 }
  0x19   :  { %1332 = shalt.err (!%p1329_p10)
}
  0x1a   :  { %s1333_s4 = scalar_lea.vmem %s28_s24, 2048  ;;  %p1338_p12 = scmp.lt.s32.totalorder %s28_s24, %s28_s24 }
  0x1b   :  { %p1334_p11 = scmp.ne.s32.totalorder %s28_s24, %s1333_s4  ;;  %p1339_p13 = scmp.lt.s32.totalorder %s1333_s4, %s1333_s4 }
  0x1d   :  { %p1340_p0 = por %p1339_p13, %p1338_p12 }
  0x1f   :  { %p1341_p1 = pnand %p1340_p0, %p1334_p11 }
  0x21   :  { %1344 = shalt.err (!%p1341_p1)
}
  0x22   :  { %33 = dma.hbm_to_vmem [thread:$0]  %s1711_s1, 2048, %s28_s24, [#allocation6], %s1374_s19, %s1374_s19, %s1375_s20  }
  0x23   :  { %1367 = dma.done.wait [#allocation3], 256  }
  0x24   :  { %1368 = vsyncadd [#allocation3], 4294967040 }
  0x25   :  { %1369 = dma.done.wait [#allocation6], 2048  }
  0x26   :  { %1370 = vsyncadd [#allocation6], 4294965248  ;;  %v44_v0 = vld [vmem:[#allocation5] sm:$0xff]  ;;  %v45_v1 = vld [vmem:[#allocation5 + $0x8] sm:$0xff]  ;;  %s1377_s1 = smov [#allocation7]  }
  0x27   :  { %v46_v2 = vld [vmem:[#allocation5 + $0x10] sm:$0xff]  ;;  %v61_v3 = vand.u32 4294901760, %v44_v0  ;;  %v64_v4 = vand.u32 4294901760, %v45_v1  ;;  %v47_v5 = vld [vmem:[#allocation5 + $0x18] sm:$0xff]  ;;  %v1423_v7 = vld [vmem:[#allocation5 + $0x20] sm:$0xff]  ;;  %s759_s6 = sshll.u32 %s1377_s1, 4  ;;  %s760_s6 = int_to_ptr.vmem [resolvable:$true] %s759_s6 }
  0x28   :  { %v67_v6 = vand.u32 4294901760, %v46_v2  ;;  %v1425_v8 = vld [vmem:[#allocation5 + $0x28] sm:$0xff]  ;;  %v70_v9 = vand.u32 4294901760, %v47_v5  ;;  %v73_v11 = vand.u32 4294901760, %v1423_v7  ;;  %v1433_v14 = vld [vmem:[#allocation5 + $0x30] sm:$0xff]  ;;  %v1435_v15 = vld [vmem:[#allocation5 + $0x38] sm:$0xff]  ;;  %p1350_p3 = scmp.lt.s32.totalorder %s760_s6, %s760_s6 }
  0x29   :  { %v1427_v10 = vpack.c.bf16 %v64_v4, %v61_v3  ;;  %v76_v12 = vand.u32 4294901760, %v1425_v8  ;;  %v1439_v16 = vld [vmem:[#allocation2] sm:$0xff]  ;;  %v79_v19 = vand.u32 4294901760, %v1433_v14  ;;  %v82_v20 = vand.u32 4294901760, %v1435_v15  ;;  %v1455_v21 = vld [vmem:[#allocation5 + $0x40] sm:$0xff]  ;;  %v1457_v22 = vld [vmem:[#allocation5 + $0x48] sm:$0xff] }
  0x2a   :  { %v1431_v13 = vpack.c.bf16 %v70_v9, %v67_v6  ;;  %v42_v17 = vmul.f32 %v1439_v16, %v1439_v16  ;;  %v1466_v25 = vld [vmem:[#allocation2 + $0x8] sm:$0xff]  ;;  %v85_v27 = vand.u32 4294901760, %v1455_v21  ;;  %v88_v28 = vand.u32 4294901760, %v1457_v22  ;;  %v1478_v29 = vld [vmem:[#allocation5 + $0x50] sm:$0xff]  ;;  %v1502_v39 = vld [vmem:[#allocation5 + $0x60] sm:$0xff]  ;;  %s1345_s7 = scalar_lea.vmem %s760_s6, 256 }
  0x2b   :  { %1091 = vmatprep.subr.bf16.mxu1 %v1427_v10  ;;  %1187 = vmatprep.subr.bf16.mxu0 %v1427_v10  ;;  %v1451_v18 = vpack.c.bf16 %v76_v12, %v73_v11  ;;  %v1474_v26 = vpack.c.bf16 %v82_v20, %v79_v19  ;;  %v1480_v30 = vld [vmem:[#allocation5 + $0x58] sm:$0xff]  ;;  %v43_v32 = vmul.f32 %v1466_v25, %v1466_v25  ;;  %v91_v36 = vand.u32 4294901760, %v1478_v29  ;;  %v1504_v40 = vld [vmem:[#allocation5 + $0x68] sm:$0xff]  ;;  %v1510_v43 = vld [vmem:[#allocation5 + $0x70] sm:$0xff]  ;;  %p1346_p2 = scmp.ne.s32.totalorder %s760_s6, %s1345_s7  ;;  %p1351_p4 = scmp.lt.s32.totalorder %s1345_s7, %s1345_s7 }
  0x2c   :  { %1093 = vmatpush3.bf16.msra.mxu1 %v1427_v10  ;;  %1189 = vmatpush3.bf16.msra.mxu0 %v1427_v10  ;;  %v1459_v23 = vand.u32 4294901760, %v42_v17  ;;  %v1488_v34 = vsub.f32 %v44_v0, %v61_v3  ;;  %v1496_v35 = vpack.c.bf16 %v88_v28, %v85_v27  ;;  %v94_v37 = vand.u32 4294901760, %v1480_v30  ;;  %v1527_v50 = vld [vmem:[#allocation5 + $0x78] sm:$0xff] }
  0x2d   :  { %1095 = vmatprep.subr.bf16.mxu1 %v1431_v13  ;;  %1191 = vmatprep.subr.bf16.mxu0 %v1431_v13  ;;  %v1500_v38 = vsub.f32 %v45_v1, %v64_v4  ;;  %v1506_v42 = vand.u32 4294901760, %v43_v32  ;;  %v1513_v45 = vsub.f32 %v46_v2, %v67_v6  ;;  %v1515_v46 = vsub.f32 %v47_v5, %v70_v9  ;;  %p1352_p5 = por %p1351_p4, %p1350_p3 }
  0x2e   :  { %v1464_v24 = vsub.f32 %v42_v17, %v1459_v23  ;;  %v164_v44 = vand.u32 4294901760, %v1488_v34  ;;  %v1523_v47 = vpack.c.bf16 %v94_v37, %v91_v36  ;;  %v97_v48 = vand.u32 4294901760, %v1502_v39 }
  0x2f   :  { %v100_v49 = vand.u32 4294901760, %v1504_v40  ;;  %v171_v51 = vand.u32 4294901760, %v1500_v38  ;;  %v103_v52 = vand.u32 4294901760, %v1510_v43  ;;  %v1532_v53 = vsub.f32 %v43_v32, %v1506_v42  ;;  %p1353_p6 = pnand %p1352_p5, %p1346_p2 }
  0x30   :  { %1097 = vmatpush3.bf16.msra.mxu1 %v1431_v13  ;;  %1193 = vmatpush3.bf16.msra.mxu0 %v1431_v13  ;;  %v143_v31 = vand.u32 4294901760, %v1464_v24  ;;  %v1537_v54 = vsub.f32 %v1423_v7, %v73_v11  ;;  %v106_v55 = vand.u32 4294901760, %v1527_v50  ;;  %v165_v56 = vsub.f32 %v1488_v34, %v164_v44 }
  0x31   :  { %1099 = vmatprep.subr.bf16.mxu1 %v1451_v18  ;;  %1195 = vmatprep.subr.bf16.mxu0 %v1451_v18  ;;  %v178_v57 = vand.u32 4294901760, %v1513_v45  ;;  %v185_v58 = vand.u32 4294901760, %v1515_v46  ;;  %v1551_v59 = vpack.c.bf16 %v100_v49, %v97_v48  ;;  %v172_v60 = vsub.f32 %v1500_v38, %v171_v51 }
  0x32   :  { %v144_v33 = vsub.f32 %v1464_v24, %v143_v31  ;;  %1017 = vmatprep.mubr.f32.mxu0 %v143_v31  ;;  %v1557_v61 = vsub.f32 %v1425_v8, %v76_v12  ;;  %v153_v62 = vand.u32 4294901760, %v1532_v53  ;;  %v192_v63 = vand.u32 4294901760, %v1537_v54 }
  0x33   :  { %v1567_v0 = vpack.c.bf16 %v106_v55, %v103_v52  ;;  %v166_v1 = vand.u32 4294901760, %v165_v56  ;;  %v179_v2 = vsub.f32 %v1513_v45, %v178_v57  ;;  %v186_v3 = vsub.f32 %v1515_v46, %v185_v58 }
  0x34   :  { %1101 = vmatpush3.bf16.msra.mxu1 %v1451_v18  ;;  %1197 = vmatpush3.bf16.msra.mxu0 %v1451_v18  ;;  %v145_v41 = vand.u32 4294901760, %v144_v33  ;;  %v173_v4 = vand.u32 4294901760, %v172_v60  ;;  %v199_v5 = vand.u32 4294901760, %v1557_v61  ;;  %v1577_v6 = vsub.f32 %v1433_v14, %v79_v19 }
  0x35   :  { %1103 = vmatprep.subr.bf16.mxu1 %v1474_v26  ;;  %1199 = vmatprep.subr.bf16.mxu0 %v1474_v26  ;;  %v1582_v7 = vsub.f32 %v1435_v15, %v82_v20  ;;  %v1218_v8 = vpack.c.bf16 %v171_v51, %v164_v44  ;;  %v154_v9 = vsub.f32 %v1532_v53, %v153_v62  ;;  %v180_v12 = vand.u32 4294901760, %v179_v2 }
  0x36   :  { %912 = vmatprep.mubr.f32.mxu1 %v145_v41  ;;  %v193_v11 = vsub.f32 %v1537_v54, %v192_v63  ;;  %v187_v17 = vand.u32 4294901760, %v186_v3  ;;  %v1591_v14 = vsub.f32 %v1455_v21, %v85_v27  ;;  %v1596_v15 = vsub.f32 %v1457_v22, %v88_v28 }
  0x37   :  { %v1122_v19 = vpack.c.bf16 %v173_v4, %v166_v1  ;;  %v200_v20 = vsub.f32 %v1557_v61, %v199_v5  ;;  %v206_v31 = vand.u32 4294901760, %v1577_v6  ;;  %v213_v32 = vand.u32 4294901760, %v1582_v7 }
  0x38   :  { %1105 = vmatpush3.bf16.msra.mxu1 %v1474_v26  ;;  %1201 = vmatpush3.bf16.msra.mxu0 %v1474_v26  ;;  %v155_v33 = vand.u32 4294901760, %v154_v9  ;;  %v1222_v41 = vpack.c.bf16 %v185_v58, %v178_v57  ;;  %v194_v21 = vand.u32 4294901760, %v193_v11  ;;  %v220_v22 = vand.u32 4294901760, %v1591_v14 }
  0x39   :  { %1107 = vmatprep.subr.bf16.mxu1 %v1496_v35  ;;  %1203 = vmatprep.subr.bf16.mxu0 %v1496_v35  ;;  %v227_v27 = vand.u32 4294901760, %v1596_v15  ;;  %v1610_v28 = vsub.f32 %v1478_v29, %v91_v36  ;;  %v1615_v44 = vsub.f32 %v1480_v30, %v94_v37  ;;  %v1126_v51 = vpack.c.bf16 %v187_v17, %v180_v12 }
  0x3a   :  { %v201_v56 = vand.u32 4294901760, %v200_v20  ;;  %v207_v57 = vsub.f32 %v1577_v6, %v206_v31  ;;  %v214_v58 = vsub.f32 %v1582_v7, %v213_v32  ;;  %v1226_v60 = vpack.c.bf16 %v199_v5, %v192_v63 }
  0x3b   :  { %v1622_v29 = vsub.f32 %v1502_v39, %v97_v48  ;;  %v221_v30 = vsub.f32 %v1591_v14, %v220_v22  ;;  %v228_v36 = vsub.f32 %v1596_v15, %v227_v27  ;;  %v234_v37 = vand.u32 4294901760, %v1610_v28 }
  0x3c   :  { %1109 = vmatpush3.bf16.msra.mxu1 %v1496_v35  ;;  %1205 = vmatpush3.bf16.msra.mxu0 %v1496_v35  ;;  %v241_v1 = vand.u32 4294901760, %v1615_v44  ;;  %v1130_v2 = vpack.c.bf16 %v201_v56, %v194_v21  ;;  %v215_v63 = vand.u32 4294901760, %v214_v58  ;;  %v1631_v39 = vsub.f32 %v1504_v40, %v100_v49 }
  0x3d   :  { %1111 = vmatprep.subr.bf16.mxu1 %v1523_v47  ;;  %1207 = vmatprep.subr.bf16.mxu0 %v1523_v47  ;;  %v1230_v48 = vpack.c.bf16 %v213_v32, %v206_v31  ;;  %v248_v3 = vand.u32 4294901760, %v1622_v29  ;;  %v222_v4 = vand.u32 4294901760, %v221_v30  ;;  %v229_v5 = vand.u32 4294901760, %v228_v36 }
  0x3e   :  { %v242_v9 = vsub.f32 %v1615_v44, %v241_v1  ;;  %v255_v40 = vand.u32 4294901760, %v1631_v39  ;;  %v1642_v49 = vsub.f32 %v1510_v43, %v103_v52  ;;  %v1647_v12 = vsub.f32 %v1527_v50, %v106_v55 }
  0x3f   :  { %v1234_v17 = vpack.c.bf16 %v227_v27, %v220_v22  ;;  %v249_v31 = vsub.f32 %v1622_v29, %v248_v3  ;;  %v1138_v32 = vpack.c.bf16 %v229_v5, %v222_v4  ;;  %v1238_v50 = vpack.c.bf16 %v241_v1, %v234_v37 }
  0x40   :  { %1113 = vmatpush3.bf16.msra.mxu1 %v1523_v47  ;;  %1209 = vmatpush3.bf16.msra.mxu0 %v1523_v47  ;;  %v243_v20 = vand.u32 4294901760, %v242_v9  ;;  %v262_v43 = vand.u32 4294901760, %v1642_v49  ;;  %v269_v52 = vand.u32 4294901760, %v1647_v12  ;;  %v1242_v56 = vpack.c.bf16 %v255_v40, %v248_v3 }
  0x41   :  { %1115 = vmatprep.subr.bf16.mxu1 %v1551_v59  ;;  %1211 = vmatprep.subr.bf16.mxu0 %v1551_v59  ;;  %v250_v55 = vand.u32 4294901760, %v249_v31  ;;  %v1154_v36 = vpack.c.bf16 %v1500_v38, %v1488_v34  ;;  %v1162_v34 = vpack.c.bf16 %v1557_v61, %v1537_v54  ;;  %v1166_v38 = vpack.c.bf16 %v1582_v7, %v1577_v6 }
  0x42   :  { %v263_v22 = vsub.f32 %v1642_v49, %v262_v43  ;;  %v270_v27 = vsub.f32 %v1647_v12, %v269_v52  ;;  %v1246_v30 = vpack.c.bf16 %v269_v52, %v262_v43 }
  0x44   :  { %1117 = vmatpush3.bf16.msra.mxu1 %v1551_v59  ;;  %1213 = vmatpush3.bf16.msra.mxu0 %v1551_v59  ;;  %v271_v58 = vand.u32 4294901760, %v270_v27 }
  0x45   :  { %1119 = vmatprep.subr.bf16.mxu1 %v1567_v0  ;;  %1215 = vmatprep.subr.bf16.mxu0 %v1567_v0 }
  0x48   :  { %1121 = vmatpush3.bf16.msra.mxu1 %v1567_v0  ;;  %1217 = vmatpush3.bf16.msra.mxu0 %v1567_v0 }
  0x49   :  { %1123 = vmatprep.subr.bf16.mxu1 %v1122_v19  ;;  %1219 = vmatprep.subr.bf16.mxu0 %v1218_v8 }
  0x4b   :  { %913 = vmatmul.mubr.f32.vlgmr.msra.gmra.mrb[0].mxu1 %v155_v33  ;;  %1018 = vmatmul.mubr.f32.vlgmr.msra.gmra.mrb[0].mxu0 %v153_v62  ;;  %v208_v62 = vand.u32 4294901760, %v207_v57  ;;  %v256_v33 = vsub.f32 %v1631_v39, %v255_v40  ;;  %v264_v57 = vand.u32 4294901760, %v263_v22 }
  0x4c   :  { %1125 = vmatpush3.bf16.msra.mxu1 %v1122_v19  ;;  %1221 = vmatpush3.bf16.msra.mxu0 %v1218_v8  ;;  %v235_v8 = vsub.f32 %v1610_v28, %v234_v37  ;;  %v1158_v37 = vpack.c.bf16 %v1515_v46, %v1513_v45 }
  0x4d   :  { %1127 = vmatprep.subr.bf16.mxu1 %v1126_v51  ;;  %1223 = vmatprep.subr.bf16.mxu0 %v1222_v41  ;;  %v1134_v11 = vpack.c.bf16 %v215_v63, %v208_v62  ;;  %v257_v21 = vand.u32 4294901760, %v256_v33 }
  0x4e   :  { %947 = vmatprep.mubr.f32.mxu1 %v1459_v23  ;;  %1052 = vmatprep.mubr.f32.mxu0 %v1459_v23  ;;  %v236_v19 = vand.u32 4294901760, %v235_v8 }
  0x50   :  { %1129 = vmatpush3.bf16.msra.mxu1 %v1126_v51  ;;  %1225 = vmatpush3.bf16.msra.mxu0 %v1222_v41  ;;  %v1142_v41 = vpack.c.bf16 %v243_v20, %v236_v19  ;;  %v1146_v51 = vpack.c.bf16 %v257_v21, %v250_v55 }
  0x51   :  { %1131 = vmatprep.subr.bf16.mxu1 %v1130_v2  ;;  %1227 = vmatprep.subr.bf16.mxu0 %v1226_v60 }
  0x54   :  { %1133 = vmatpush3.bf16.msra.mxu1 %v1130_v2  ;;  %1229 = vmatpush3.bf16.msra.mxu0 %v1226_v60  ;;  %v1150_v60 = vpack.c.bf16 %v271_v58, %v264_v57 }
  0x55   :  { %1135 = vmatprep.subr.bf16.mxu1 %v1134_v11  ;;  %1231 = vmatprep.subr.bf16.mxu0 %v1230_v48 }
  0x58   :  { %1137 = vmatpush3.bf16.msra.mxu1 %v1134_v11  ;;  %1233 = vmatpush3.bf16.msra.mxu0 %v1230_v48 }
  0x59   :  { %1139 = vmatprep.subr.bf16.mxu1 %v1138_v32  ;;  %1235 = vmatprep.subr.bf16.mxu0 %v1234_v17 }
  0x5c   :  { %1141 = vmatpush3.bf16.msra.mxu1 %v1138_v32  ;;  %1237 = vmatpush3.bf16.msra.mxu0 %v1234_v17 }
  0x5d   :  { %1143 = vmatprep.subr.bf16.mxu1 %v1142_v41  ;;  %1239 = vmatprep.subr.bf16.mxu0 %v1238_v50 }
  0x60   :  { %1145 = vmatpush3.bf16.msra.mxu1 %v1142_v41  ;;  %1241 = vmatpush3.bf16.msra.mxu0 %v1238_v50 }
  0x61   :  { %1147 = vmatprep.subr.bf16.mxu1 %v1146_v51  ;;  %1243 = vmatprep.subr.bf16.mxu0 %v1242_v56 }
  0x64   :  { %1149 = vmatpush3.bf16.msra.mxu1 %v1146_v51  ;;  %1245 = vmatpush3.bf16.msra.mxu0 %v1242_v56 }
  0x65   :  { %1151 = vmatprep.subr.bf16.mxu1 %v1150_v60  ;;  %1247 = vmatprep.subr.bf16.mxu0 %v1246_v30 }
  0x68   :  { %1153 = vmatpush3.bf16.msra.mxu1 %v1150_v60  ;;  %1249 = vmatpush3.bf16.msra.mxu0 %v1246_v30 }
  0x69   :  { %1155 = vmatprep.subr.bf16.mxu1 %v1154_v36  ;;  %1251 = vmatprep.subr.bf16.mxu0 %v1427_v10 }
  0x6b   :  { %948 = vmatmul.mubr.f32.vlgmr.msra.gmra.mrb[0].mxu1 %v1506_v42  ;;  %1053 = vmatmul.mubr.f32.vlgmr.msra.gmra.mrb[0].mxu0 %v1506_v42 }
  0x6c   :  { %1157 = vmatpush3.bf16.msra.mxu1 %v1154_v36  ;;  %1253 = vmatpush3.bf16.msra.mxu0 %v1427_v10  ;;  %v1170_v10 = vpack.c.bf16 %v1596_v15, %v1591_v14 }
  0x6d   :  { %1159 = vmatprep.subr.bf16.mxu1 %v1158_v37  ;;  %1255 = vmatprep.subr.bf16.mxu0 %v1431_v13 }
  0x6e   :  { %982 = vmatprep.mubr.f32.mxu1 %v1464_v24  ;;  %1087 = vmatprep.mubr.f32.mxu0 %v1459_v23  ;;  %v1182_v23 = vpack.c.bf16 %v1647_v12, %v1642_v49 }
  0x70   :  { %1161 = vmatpush3.bf16.msra.mxu1 %v1158_v37  ;;  %1257 = vmatpush3.bf16.msra.mxu0 %v1431_v13  ;;  %v1174_v13 = vpack.c.bf16 %v1615_v44, %v1610_v28 }
  0x71   :  { %1163 = vmatprep.subr.bf16.mxu1 %v1162_v34  ;;  %1259 = vmatprep.subr.bf16.mxu0 %v1451_v18 }
  0x74   :  { %1165 = vmatpush3.bf16.msra.mxu1 %v1162_v34  ;;  %1261 = vmatpush3.bf16.msra.mxu0 %v1451_v18  ;;  %v1178_v18 = vpack.c.bf16 %v1631_v39, %v1622_v29 }
  0x75   :  { %1167 = vmatprep.subr.bf16.mxu1 %v1166_v38  ;;  %1263 = vmatprep.subr.bf16.mxu0 %v1474_v26 }
  0x78   :  { %1169 = vmatpush3.bf16.msra.mxu1 %v1166_v38  ;;  %1265 = vmatpush3.bf16.msra.mxu0 %v1474_v26 }
  0x79   :  { %1171 = vmatprep.subr.bf16.mxu1 %v1170_v10  ;;  %1267 = vmatprep.subr.bf16.mxu0 %v1496_v35 }
  0x7c   :  { %1173 = vmatpush3.bf16.msra.mxu1 %v1170_v10  ;;  %1269 = vmatpush3.bf16.msra.mxu0 %v1496_v35 }
  0x7d   :  { %1175 = vmatprep.subr.bf16.mxu1 %v1174_v13  ;;  %1271 = vmatprep.subr.bf16.mxu0 %v1523_v47 }
  0x80   :  { %1177 = vmatpush3.bf16.msra.mxu1 %v1174_v13  ;;  %1273 = vmatpush3.bf16.msra.mxu0 %v1523_v47 }
  0x81   :  { %1179 = vmatprep.subr.bf16.mxu1 %v1178_v18  ;;  %1275 = vmatprep.subr.bf16.mxu0 %v1551_v59 }
  0x84   :  { %1181 = vmatpush3.bf16.msra.mxu1 %v1178_v18  ;;  %1277 = vmatpush3.bf16.msra.mxu0 %v1551_v59 }
  0x85   :  { %1183 = vmatprep.subr.bf16.mxu1 %v1182_v23  ;;  %1279 = vmatprep.subr.bf16.mxu0 %v1567_v0 }
  0x88   :  { %1185 = vmatpush3.bf16.msra.mxu1 %v1182_v23  ;;  %1281 = vmatpush3.bf16.msra.mxu0 %v1567_v0 }
  0x8b   :  { %983 = vmatmul.mubr.f32.vlgmr.msra.gmra.mrb[0].mxu1 %v1532_v53  ;;  %1088 = vmatmul.mubr.f32.vlgmr.msra.gmra.mrb[0].mxu0 %v1506_v42 }
 0x15e   :  { %v984_v24 = vpop.f32.mrb[0].mxu1  ;;  %v1089_v26 = vpop.f32.mrb[0].mxu0 }
 0x15f   :  { %v1282_v35 = vadd.f32 %v1089_v26, %v984_v24  ;;  %v418_v45 = vpop.f32.mrb[1].mxu1  ;;  %v734_v46 = vpop.f32.mrb[1].mxu0 }
 0x160   :  { %v1283_v47 = vadd.f32 %v734_v46, %v418_v45 }
 0x161   :  { %v745_v54 = vmul.f32 0.03125, %v1282_v35 }
 0x162   :  { %v744_v61 = vmul.f32 0.03125, %v1283_v47 }
 0x163   :  { %v747_v6 = vadd.f32 1e-06, %v745_v54 }
 0x164   :  { %v746_v59 = vadd.f32 1e-06, %v744_v61 }
 0x165   :  { %1297 = vrsqrt.f32 %v747_v6 }
 0x166   :  { %1299 = vrsqrt.f32 %v746_v59 }
 0x16f   :  { %v1298_v7 = vpop.eup %1297 }
 0x170   :  { %v1300_v0 = vpop.eup %1299  ;;  %v751_v53 = vmul.f32 %v1298_v7, %v1466_v25 }
 0x171   :  { %v750_v42 = vmul.f32 %v1300_v0, %v1439_v16 }
 0x172   :  { %753 = vst [vmem:[#allocation7 + $0x8] sm:$0xff] %v751_v53 }
 0x173   :  { %752 = vst [vmem:[#allocation7] sm:$0xff] %v750_v42 }
 0x174   :  { %1356 = shalt.err (!%p1353_p6)
}
 0x175   :  { %s1357_s10 = scalar_lea.hbm %s1712_s2, 256 }
 0x176   :  { %p1358_p7 = scmp.ne.s32.totalorder %s1712_s2, %s1357_s10  ;;  %p1361_p8 = scmp.lt.u32.totalorder %s1357_s10, %s1712_s2 }
 0x178   :  { %p1363_p9 = pnand %p1361_p8, %p1358_p7 }
 0x17a   :  { %1366 = shalt.err (!%p1363_p9)
}
 0x17b   :  { %765 = dma.vmem_to_hbm [thread:$0]  %s760_s6, 256, %s1712_s2, [#allocation4], %s1374_s19, %s1374_s19, %s1375_s20  }
 0x17c   :  { %1371 = dma.done.wait [#allocation4], 256  }
 0x17d   :  { %1372 = vsyncadd [#allocation4], 4294967040 }
 0x17e   :  { %769 = vsyncpa [#allocation3], 1 }
 0x17f   :  { %770 = vsyncpa [#allocation6], 1 }
 0x180   :  { %771 = vsyncpa [#allocation4], 1 }

</bundles_post_ra>
